<compile_context>
chip_gen: v7x
topology: tpu7x:2x2x1
jax: 0.10.0
libtpu: 0.0.40
codegen_flags: <defaults>
</compile_context>

<pallas_src>
import math

import jax
import jax.numpy as jnp
from jax.experimental import pallas as pl
from jax.experimental.pallas import tpu as pltpu


def _pr_embedding_bag_kernel(idx_ref, psw_ref, table_hbm, proj_ref, out_ref,
                             rows_ref, copy_sems):
    """Gathers L rows HBM->VMEM, then bag = psw @ rows and out = bag @ proj."""
    L = idx_ref.shape[0]            # number of real indices (static)
    L_pad, D = rows_ref.shape       # staging buffer; L_pad = round_up(L, 8)

    # Zero the padded tail rows so the 0-weighted pad lanes cannot inject NaNs
    # (uninitialized VMEM) into the matmul.  Done before the DMAs start.
    if L_pad > L:
        rows_ref[pl.ds(L, L_pad - L), :] = jnp.zeros((L_pad - L, D),
                                                     rows_ref.dtype)

    # 1) Launch all row-gather DMAs (HBM -> VMEM staging).  Every copy is in
    #    flight concurrently; latency is hidden behind a single wait pass.
    @pl.loop(0, L)
    def _start(l):
        pltpu.make_async_copy(
            table_hbm.at[pl.ds(idx_ref[l], 1), :],
            rows_ref.at[pl.ds(l, 1), :],
            copy_sems.at[l],
        ).start()

    # 2) Wait for every gather (src slice is shape-only, matches copy size).
    @pl.loop(0, L)
    def _wait(l):
        pltpu.make_async_copy(
            table_hbm.at[pl.ds(0, 1), :],
            rows_ref.at[pl.ds(l, 1), :],
            copy_sems.at[l],
        ).wait()

    # 3) Weighted bag-sum as one MXU matmul: (1, L_pad) @ (L_pad, D) -> (1, D).
    bag = jnp.dot(psw_ref[...], rows_ref[...].astype(jnp.float32),
                  preferred_element_type=jnp.float32)

    # 4) Projection: (1, D) @ (D, base_dim) -> (1, base_dim).
    out_ref[...] = jnp.dot(bag, proj_ref[...].astype(jnp.float32),
                           preferred_element_type=jnp.float32
                           ).astype(out_ref.dtype)


def pr_embedding_bag(indices, emb_weight, proj_weight_t, per_sample_weights=None):
    """Mirrors PrEmbeddingBag.forward for a 1-D `indices` tensor (one bag).

    proj_weight_t is (embedding_dim, base_dim) — i.e. nn.Linear's weight,
    transposed.  For the Identity case (embedding_dim == base_dim) pass
    jnp.eye(embedding_dim).
    """
    L = int(indices.shape[0])
    num_embeddings, D = emb_weight.shape
    B = proj_weight_t.shape[1]
    L_pad = max(8, ((L + 7) // 8) * 8)          # sublane-aligned staging rows

    if per_sample_weights is None:
        per_sample_weights = jnp.ones((L,), jnp.float32)
    # per_sample_weights as one zero-padded VMEM row (1, L_pad).
    psw_row = jnp.zeros((1, L_pad), jnp.float32).at[0, :L].set(
        per_sample_weights.astype(jnp.float32))

    # Clamp indices so a bad index can't make the gather DMA read out of range.
    idx = jnp.clip(indices.astype(jnp.int32), 0, num_embeddings - 1)

    # Explicit scoped-VMEM budget from the buffers that actually live in VMEM.
    itemsize = emb_weight.dtype.itemsize
    vmem_need = (proj_weight_t.size * proj_weight_t.dtype.itemsize   # proj
                 + L_pad * D * itemsize                              # row staging
                 + psw_row.size * 4                                  # psw row
                 + B * 4)                                            # output
    vmem_limit = int(min(max(2 * vmem_need + (4 << 20), 16 << 20), 48 << 20))

    kernel = pl.pallas_call(
        _pr_embedding_bag_kernel,
        out_shape=jax.ShapeDtypeStruct((1, B), jnp.float32),
        in_specs=[
            pl.BlockSpec(memory_space=pltpu.MemorySpace.SMEM),   # indices
            pl.BlockSpec(memory_space=pltpu.MemorySpace.VMEM),   # psw row (1, L_pad)
            pl.BlockSpec(memory_space=pl.ANY),                   # emb table stays in HBM
            pl.BlockSpec(memory_space=pltpu.MemorySpace.VMEM),   # proj (D, B)
        ],
        out_specs=pl.BlockSpec(memory_space=pltpu.MemorySpace.VMEM),
        scratch_shapes=[
            pltpu.VMEM((L_pad, D), emb_weight.dtype),            # gathered rows
            pltpu.SemaphoreType.DMA((L,)),                       # one sem per row DMA
        ],
        compiler_params=pltpu.CompilerParams(vmem_limit_bytes=vmem_limit),
    )
    return kernel(idx, psw_row, emb_weight, proj_weight_t)

# TODO(synk): multi-bag `offsets` support would need a grid over bags with a
# per-bag accumulator reset; the PyTorch forward() forces a single bag, so it
# is intentionally not implemented here.


def _xavier_uniform(key, shape):
    # PyTorch xavier_uniform_ on a 2-D tensor: fan_out = shape[0], fan_in = shape[1]
    fan_out, fan_in = shape
    bound = math.sqrt(6.0 / (fan_in + fan_out))
    return jax.random.uniform(key, shape, jnp.float32, minval=-bound, maxval=bound)


if __name__ == "__main__":
    # Module hyper-params (embedding_dim < base_dim -> projection path exercised).
    num_embeddings, embedding_dim, base_dim = 256, 64, 128
    seq_len = 8

    key = jax.random.PRNGKey(0)
    k_emb, k_proj, k_idx, k_psw = jax.random.split(key, 4)

    # Parameter shapes match PrEmbeddingBag.__init__.
    emb_weight = _xavier_uniform(k_emb, (num_embeddings, embedding_dim))
    proj_weight = _xavier_uniform(k_proj, (base_dim, embedding_dim))  # nn.Linear layout
    proj_weight_t = proj_weight.T                                     # (D, B) for the kernel

    # Example inputs.
    indices = jax.random.randint(k_idx, (seq_len,), 0, num_embeddings, dtype=jnp.int32)
    per_sample_weights = jax.random.uniform(k_psw, (seq_len,), jnp.float32)

    # Weighted path.
    out = pr_embedding_bag(indices, emb_weight, proj_weight_t, per_sample_weights)
    out = jax.block_until_ready(out)

    bag_ref = (per_sample_weights[:, None] * emb_weight[indices]).sum(0, keepdims=True)
    out_ref = bag_ref @ proj_weight_t
    assert out.shape == (1, base_dim)
    assert jnp.allclose(out, out_ref, atol=1e-5, rtol=1e-5)

    # Unweighted path (per_sample_weights=None -> ones).
    out2 = pr_embedding_bag(indices, emb_weight, proj_weight_t)
    out2 = jax.block_until_ready(out2)
    out2_ref = emb_weight[indices].sum(0, keepdims=True) @ proj_weight_t
    assert jnp.allclose(out2, out2_ref, atol=1e-5, rtol=1e-5)

    print("KERNEL_OK")
</pallas_src>

<mosaic_0001>
module attributes {stable_mosaic.version = 11 : i64} {
  func.func @_pr_embedding_bag_kernel(%arg0: memref<8xi32, #tpu.memory_space<smem>>, %arg1: memref<1x8xf32, #tpu.memory_space<vmem>>, %arg2: memref<256x64xf32, #tpu.memory_space<any>>, %arg3: memref<64x128xf32, #tpu.memory_space<vmem>>, %arg4: memref<1x128xf32, #tpu.memory_space<vmem>>, %arg5: memref<8x64xf32, #tpu.memory_space<vmem>>, %arg6: memref<8x!tpu.dma_semaphore, #tpu.memory_space<semaphore_mem>>) attributes {dimension_semantics = [], scalar_prefetch = 0 : i64, scratch_operands = 2 : i64, tpu.core_type = #tpu.core_type<tc>} {
    %c0_i32 = arith.constant 0 : i32
    %c8_i32 = arith.constant 8 : i32
    %0 = arith.addi %c0_i32, %c8_i32 : i32
    %c1_i32 = arith.constant 1 : i32
    scf.for %arg7 = %c0_i32 to %0 step %c1_i32  : i32 {
      %c1_i32_13 = arith.constant 1 : i32
      %8 = arith.muli %arg7, %c1_i32_13 : i32
      %c0_i32_14 = arith.constant 0 : i32
      %9 = arith.addi %c0_i32_14, %8 : i32
      %10 = arith.index_cast %9 : i32 to index
      %11 = memref.load %arg0[%10] : memref<8xi32, #tpu.memory_space<smem>>
      %c0_i32_15 = arith.constant 0 : i32
      %12 = tpu.memref_slice %arg2[%11, %c0_i32_15] : memref<256x64xf32, #tpu.memory_space<any>> -> memref<1x64xf32, #tpu.memory_space<any>>
      %c0_i32_16 = arith.constant 0 : i32
      %13 = tpu.memref_slice %arg5[%9, %c0_i32_16] : memref<8x64xf32, #tpu.memory_space<vmem>> -> memref<1x64xf32, #tpu.memory_space<vmem>>
      %14 = tpu.memref_slice %arg6[%9] : memref<8x!tpu.dma_semaphore, #tpu.memory_space<semaphore_mem>> -> memref<1x!tpu.dma_semaphore, #tpu.memory_space<semaphore_mem>>
      %15 = tpu.memref_squeeze %14 : memref<1x!tpu.dma_semaphore, #tpu.memory_space<semaphore_mem>> -> memref<!tpu.dma_semaphore, #tpu.memory_space<semaphore_mem>>
      tpu.enqueue_dma source(%12 : memref<1x64xf32, #tpu.memory_space<any>>) target(%13 : memref<1x64xf32, #tpu.memory_space<vmem>>) target_semaphore(%15 : memref<!tpu.dma_semaphore, #tpu.memory_space<semaphore_mem>>)
    }
    %c8_i32_0 = arith.constant 8 : i32
    %c0_i32_1 = arith.constant 0 : i32
    %c8_i32_2 = arith.constant 8 : i32
    %1 = arith.addi %c0_i32_1, %c8_i32_2 : i32
    %c1_i32_3 = arith.constant 1 : i32
    scf.for %arg7 = %c0_i32_1 to %1 step %c1_i32_3  : i32 {
      %c1_i32_13 = arith.constant 1 : i32
      %8 = arith.muli %arg7, %c1_i32_13 : i32
      %c0_i32_14 = arith.constant 0 : i32
      %9 = arith.addi %c0_i32_14, %8 : i32
      %c0_i32_15 = arith.constant 0 : i32
      %c0_i32_16 = arith.constant 0 : i32
      %10 = tpu.memref_slice %arg2[%c0_i32_15, %c0_i32_16] : memref<256x64xf32, #tpu.memory_space<any>> -> memref<1x64xf32, #tpu.memory_space<any>>
      %c0_i32_17 = arith.constant 0 : i32
      %11 = tpu.memref_slice %arg5[%9, %c0_i32_17] : memref<8x64xf32, #tpu.memory_space<vmem>> -> memref<1x64xf32, #tpu.memory_space<vmem>>
      %12 = tpu.memref_slice %arg6[%9] : memref<8x!tpu.dma_semaphore, #tpu.memory_space<semaphore_mem>> -> memref<1x!tpu.dma_semaphore, #tpu.memory_space<semaphore_mem>>
      %13 = tpu.memref_squeeze %12 : memref<1x!tpu.dma_semaphore, #tpu.memory_space<semaphore_mem>> -> memref<!tpu.dma_semaphore, #tpu.memory_space<semaphore_mem>>
      tpu.wait_dma2 semaphore(%13 : memref<!tpu.dma_semaphore, #tpu.memory_space<semaphore_mem>>) src(%10 : memref<1x64xf32, #tpu.memory_space<any>>) dst(%11 : memref<1x64xf32, #tpu.memory_space<vmem>>)
    }
    %c8_i32_4 = arith.constant 8 : i32
    %c0 = arith.constant 0 : index
    %c0_5 = arith.constant 0 : index
    %2 = vector.load %arg1[%c0, %c0_5] : memref<1x8xf32, #tpu.memory_space<vmem>>, vector<1x8xf32>
    %c0_6 = arith.constant 0 : index
    %c0_7 = arith.constant 0 : index
    %3 = vector.load %arg5[%c0_6, %c0_7] : memref<8x64xf32, #tpu.memory_space<vmem>>, vector<8x64xf32>
    %cst = arith.constant dense<0.000000e+00> : vector<1x64xf32>
    %4 = tpu.matmul %2, %3, %cst {dimension_numbers = #tpu.dot_dimension_numbers<[1], [0], [0], [1], [0, 0, 1, 1], [], []>} : vector<1x8xf32>, vector<8x64xf32>, vector<1x64xf32> -> vector<1x64xf32>
    %c0_8 = arith.constant 0 : index
    %c0_9 = arith.constant 0 : index
    %5 = vector.load %arg3[%c0_8, %c0_9] : memref<64x128xf32, #tpu.memory_space<vmem>>, vector<64x128xf32>
    %cst_10 = arith.constant dense<0.000000e+00> : vector<1x128xf32>
    %6 = tpu.matmul %4, %5, %cst_10 {dimension_numbers = #tpu.dot_dimension_numbers<[1], [0], [0], [1], [0, 0, 1, 1], [], []>} : vector<1x64xf32>, vector<64x128xf32>, vector<1x128xf32> -> vector<1x128xf32>
    %c0_11 = arith.constant 0 : index
    %c0_12 = arith.constant 0 : index
    %7 = vector.load %arg4[%c0_11, %c0_12] : memref<1x128xf32, #tpu.memory_space<vmem>>, vector<1x128xf32>
    tpu.vector_store %arg4[%c0_11, %c0_12], %6 {strides = array<i32>} : memref<1x128xf32, #tpu.memory_space<vmem>>, vector<1x128xf32>,
    return
  }
}

</mosaic_0001>

<bundles_post_ra>
// kernel: tpu_custom_call.1
= control target key start
LH: loop header
LB: loop body
LE: loop exit
PB: predicated region body
PF: predicated region fallthrough
CT: control target
= control target key end

     0   :  { %9 = vsyncpa [#allocation6], 0  ;;  %s555_s0 = inlined_call_operand.vmem [shape: s32[8], index: 0, kind: input, shape index: {}]   ;;  %s556_s1 = inlined_call_operand.vmem [shape: f32[1,8], index: 1, kind: input, shape index: {}]   ;;  %s557_s2 = inlined_call_operand.vmem [shape: f32[256,64], index: 2, kind: input, shape index: {}]   ;;  %s558_s3 = inlined_call_operand.vmem [shape: f32[64,128], index: 3, kind: input, shape index: {}]   ;;  %s559_s4 = inlined_call_operand.hbm [shape: f32[1,128], index: 4, kind: output, shape index: {}]  }
   0x1   :  { %10 = vsyncpa [#allocation5], 0  ;;  %s17_s17 = sshll.u32 %s555_s0, 4  ;;  %s18_s17 = int_to_ptr.vmem [resolvable:$true] %s17_s17 }
   0x2   :  { %s424_s18 = scalar_lea.vmem %s18_s17, 16  ;;  %p429_p1 = scmp.lt.s32.totalorder %s18_s17, %s18_s17 }
   0x3   :  { %p425_p0 = scmp.ne.s32.totalorder %s18_s17, %s424_s18  ;;  %p430_p2 = scmp.lt.s32.totalorder %s424_s18, %s424_s18 }
   0x5   :  { %p431_p3 = por %p430_p2, %p429_p1 }
   0x7   :  { %p432_p4 = pnand %p431_p3, %p425_p0 }
   0x9   :  { %435 = shalt.err (!%p432_p4)
}
   0xa   :  { %s480_s19 = smov [#allocation4]  }
   0xb   :  { %20 = dma.vmem_to_smem %s18_s17, 16, %s480_s19, [#allocation6]  }
   0xc   :  { %466 = dma.done.wait [#allocation6], 16  }
   0xd   :  { %467 = vsyncadd [#allocation6], 4294967280 }
   0xe   :  { %28 = sfence }
   0xf   :  { %s472_s20 = smov 0  }
  0x10 LB: > { %s35_s21 = sld [smem:[#allocation4 + %s474_s20]]  ;;  %s37_s24 = scalar_lea.vmem [#allocation2], %s474_s20  ;;  %s474_s20 = sphi %s472_s20, %s34_s20  }
  0x11   : > { %s38_s25 = scalar_lea.sflag [#allocation3], %s474_s20 }
  0x16   : > { %s36_s23 = scalar_lea.vmem %s557_s2, %s35_s21 }
  0x17   : > { %v56_v0 = vld [vmem:[%s36_s23] sm:$0x1] }
  0x18   : > { %57 = vst [vmem:[%s37_s24] sm:$0x1] %v56_v0 }
  0x19   : > { %82 = vsyncadd %s38_s25, 16  ;;  %s34_s20 = sadd.s32 1, %s474_s20  }
  0x1a   : > { %p31_p5 = scmp.ge.s32.totalorder %s34_s20, 8  }
  0x1b   :  { %s476_s26 = smov (%p31_p5), 0  }
  0x1c   :  { %33 = sbr.rel (!%p31_p5) target bundleno = 16 (0x10), region = 101 }
  0x23 LB: > { %s89_s27 = scalar_lea.sflag [#allocation3], %s478_s26  ;;  %s478_s26 = sphi %s476_s26, %s88_s26  }
  0x24   : > { %468 = dma.done.wait %s89_s27, 16 }
  0x25   : > { %469 = vsyncadd %s89_s27, 4294967280  ;;  %s88_s26 = sadd.s32 1, %s478_s26  }
  0x26   : > { %p85_p6 = scmp.ge.s32.totalorder %s88_s26, 8  }
  0x27   :  { %v94_v1 = vld [vmem:[#allocation2] sm:$0xff] (%p85_p6)  ;;  %vm95_vm0 = vcmask (%p85_p6), 64512   ;;  %v481_v3 = vmov (%p85_p6), 0.0   ;;  %vm482_vm1 = vmmov (%p85_p6), 0   ;;  %v170_v5 = vld [vmem:[%s558_s3 + $0x8] sm:$0xff] (%p85_p6)  ;;  %v171_v6 = vld [vmem:[%s558_s3 + $0x10] sm:$0xff] (%p85_p6) }
  0x28   :  { %87 = sbr.rel (!%p85_p6) target bundleno = 35 (0x23), region = 112  ;;  %v93_v2 = vld [vmem:[%s556_s1] sm:$0x1] (%p85_p6)  ;;  %367 = vmatprep.subr.mxu0 (%p85_p6), %v481_v3  ;;  %369 = vmatprep.mubr.msk.f32.mxu0 (%p85_p6), %vm482_vm1, %v481_v3  ;;  %v483_v7 = vmov (%p85_p6), 0.0|0.0   ;;  %v172_v9 = vld [vmem:[%s558_s3 + $0x18] sm:$0xff] (%p85_p6)  ;;  %v174_v12 = vld [vmem:[%s558_s3 + $0x28] sm:$0xff] (%p85_p6) }
  0x29   :  { %v169_v4 = vld [vmem:[%s558_s3] sm:$0xff] (%p85_p6)  ;;  %368 = vmatpush3.msra.mxu0 (%p85_p6), %v94_v1  ;;  %391 = vmatprep.subr.bf16.mxu1 (%p85_p6), %v483_v7  ;;  %v395_v10 = vpack.c.bf16 (%p85_p6), %v172_v9, %v171_v6  ;;  %v175_v14 = vld [vmem:[%s558_s3 + $0x30] sm:$0xff] (%p85_p6)  ;;  %v176_v15 = vld [vmem:[%s558_s3 + $0x38] sm:$0xff] (%p85_p6)  ;;  %vm177_vm2 = vcmask (%p85_p6), 523264   ;;  %s484_s18 = smov (%p85_p6), [#allocation7]  }
  0x2a   :  { %v392_v8 = vpack.c.bf16 (%p85_p6), %v170_v5, %v169_v4  ;;  %370 = vmatmul.mubr.msk.f32.vlgmr.msra.gmra.mrb[0].mxu0 (%p85_p6), %vm95_vm0, %v93_v2  ;;  %388 = vmatprep.mubr.msk.f32.mxu1 (%p85_p6), %vm482_vm1, %v481_v3  ;;  %v173_v11 = vld [vmem:[%s558_s3 + $0x20] sm:$0xff] (%p85_p6)  ;;  %v401_v16 = vpack.c.bf16 (%p85_p6), %v176_v15, %v175_v14  ;;  %s258_s19 = sshll.u32 (%p85_p6), %s484_s18, 4  ;;  %s259_s19 = int_to_ptr.vmem [resolvable:$true] %s258_s19 }
  0x2b   :  { %v398_v13 = vpack.c.bf16 (%p85_p6), %v174_v12, %v173_v11  ;;  %s436_s20 = scalar_lea.vmem (%p85_p6), %s259_s19, 16  ;;  %s440_s21 = scalar_lea.vmem (%p85_p6), %s259_s19, 32 }
  0x2c   :  { %393 = vmatpush3.bf16.msra.mxu1 (%p85_p6), %v392_v8  ;;  %p437_p7 = scmp.ne.s32.totalorder (%p85_p6), %s259_s19, %s436_s20  ;;  %p441_p8 = scmp.lt.s32.totalorder (%p85_p6), %s259_s19, %s259_s19 }
  0x2d   :  { %394 = vmatprep.subr.bf16.mxu1 (%p85_p6), %v483_v7  ;;  %p442_p9 = scmp.lt.s32.totalorder (%p85_p6), %s440_s21, %s436_s20 }
  0x2f   :  { %p443_p10 = por %p442_p9, %p441_p8 }
  0x30   :  { %396 = vmatpush3.bf16.msra.mxu1 %v395_v10 }
  0x31   :  { %397 = vmatprep.subr.bf16.mxu1 %v483_v7  ;;  %p444_p11 = pnand %p443_p10, %p437_p7 }
  0x34   :  { %399 = vmatpush3.bf16.msra.mxu1 %v398_v13 }
  0x35   :  { %400 = vmatprep.subr.bf16.mxu1 %v483_v7 }
  0x38   :  { %402 = vmatpush3.bf16.msra.mxu1 %v401_v16 }
  0xfd   :  { %v165_v17 = vpop.f32.mrb[0].mxu0 }
  0xfe   :  { %v371_v18 = vpop.f32.mrb[1].mxu0  ;;  %389 = vmatmul.mubr.msk.f32.vlgmr.msra.gmra.mrb[0].mxu1 %vm177_vm2, %v165_v17 }
 0x1d1   :  { %v247_v19 = vpop.f32.mrb[0].mxu1 }
 0x1d2   :  { %251 = vst [vmem:[#allocation7] sm:$0x1] %v247_v19  ;;  %v390_v20 = vpop.f32.mrb[1].mxu1 }
 0x1d3   :  { %447 = shalt.err (!%p444_p11)
}
 0x1d4   :  { %s448_s0 = scalar_lea.hbm %s559_s4, 16 }
 0x1d5   :  { %p449_p12 = scmp.ne.s32.totalorder %s559_s4, %s448_s0  ;;  %p452_p13 = scmp.lt.u32.totalorder %s448_s0, %s559_s4 }
 0x1d7   :  { %p454_p0 = pnand %p452_p13, %p449_p12 }
 0x1d9   :  { %457 = shalt.err (!%p454_p0)
}
 0x1da   :  { %261 = dma.vmem_to_hbm [thread:$0]  %s259_s19, 16, %s559_s4, [#allocation5]  }
 0x1db   :  { %470 = dma.done.wait [#allocation5], 16  }
 0x1dc   :  { %471 = vsyncadd [#allocation5], 4294967280 }
 0x1dd   :  { %265 = vsyncpa [#allocation5], 1 }
 0x1de   :  { %266 = vsyncpa [#allocation6], 1 }
 0x1df   :  { %267 = vsyncmov [#allocation3] }
 0x1e2   :  { %s268_s29 = vpop.sfrf %267 }
 0x1e3   :  { %p348_p1 = scmp.ne.s32.totalorder %s268_s29, 0 }
 0x1e5   :  { %272 = shalt.err (%p348_p1)  }
 0x1e6   :  { %274 = vsyncmov [#allocation3 + $0x1] }
 0x1e9   :  { %s275_s2 = vpop.sfrf %274 }
 0x1ea   :  { %p349_p2 = scmp.ne.s32.totalorder %s275_s2, 0 }
 0x1ec   :  { %279 = shalt.err (%p349_p2)  }
 0x1ed   :  { %281 = vsyncmov [#allocation3 + $0x2] }
 0x1f0   :  { %s282_s30 = vpop.sfrf %281 }
 0x1f1   :  { %p350_p3 = scmp.ne.s32.totalorder %s282_s30, 0 }
 0x1f3   :  { %286 = shalt.err (%p350_p3)  }
 0x1f4   :  { %288 = vsyncmov [#allocation3 + $0x3] }
 0x1f7   :  { %s289_s5 = vpop.sfrf %288 }
 0x1f8   :  { %p351_p4 = scmp.ne.s32.totalorder %s289_s5, 0 }
 0x1fa   :  { %293 = shalt.err (%p351_p4)  }
 0x1fb   :  { %295 = vsyncmov [#allocation3 + $0x4] }
 0x1fe   :  { %s296_s4 = vpop.sfrf %295 }
 0x1ff   :  { %p352_p5 = scmp.ne.s32.totalorder %s296_s4, 0 }
 0x201   :  { %300 = shalt.err (%p352_p5)  }
 0x202   :  { %302 = vsyncmov [#allocation3 + $0x5] }
 0x205   :  { %s303_s6 = vpop.sfrf %302 }
 0x206   :  { %p353_p6 = scmp.ne.s32.totalorder %s303_s6, 0 }
 0x208   :  { %307 = shalt.err (%p353_p6)  }
 0x209   :  { %309 = vsyncmov [#allocation3 + $0x6] }
 0x20c   :  { %s310_s7 = vpop.sfrf %309 }
 0x20d   :  { %p354_p7 = scmp.ne.s32.totalorder %s310_s7, 0 }
 0x20f   :  { %314 = shalt.err (%p354_p7)  }
 0x210   :  { %316 = vsyncmov [#allocation3 + $0x7] }
 0x213   :  { %s317_s8 = vpop.sfrf %316 }
 0x214   :  { %p355_p8 = scmp.ne.s32.totalorder %s317_s8, 0 }
 0x216   :  { %321 = shalt.err (%p355_p8)  }

</bundles_post_ra>
